<compile_context>
chip_gen: v5e
topology: v5e:2x2
jax: 0.10.0
libtpu: 0.0.40
codegen_flags: <defaults>
</compile_context>

<pallas_src>
import jax
import jax.numpy as jnp
from jax.experimental import pallas as pl
from jax.experimental.pallas import tpu as pltpu


def _round_up(x: int, m: int) -> int:
    return ((x + m - 1) // m) * m


def _cdiv(a: int, b: int) -> int:
    return (a + b - 1) // b


def _device_kind() -> str:
    try:
        return jax.devices()[0].device_kind.lower()
    except Exception:
        return ""


def _looks_like_v7(kind: str) -> bool:
    return ("v7" in kind) or ("tpu7" in kind) or ("7x" in kind)


def weighted_loss(pred, target, weighted=1.0, *, tm=None, num_parallel=None,
                  loss_type="l2", target_tile_bytes=None, use_core_parallel=None):
    """Pallas equivalent of WeightedLoss.forward (WeightedL2 / WeightedL1).

    pred, target: [batch_size, dim] (any float dtype; bf16 is streamed as bf16 and
    cast to f32 only inside the kernel).  `weighted`: python/JAX scalar.
    Returns a 0-d float32 scalar == (loss(pred, target) * weighted).mean().
    `tm` is a rows-per-tile hint; the actual tile height is adjusted so the
    parallel slices cover the batch without redundant overhang DMAs.
    """
    B, D = pred.shape
    assert target.shape == (B, D)
    assert loss_type in ("l1", "l2")

    w_arr = jnp.asarray(weighted, dtype=jnp.float32)
    if w_arr.ndim > 0 and w_arr.size > 1:
        # TODO(synk): the PyTorch module also accepts a broadcastable per-element
        # weight tensor; only the (default) scalar-weight path is implemented here.
        raise NotImplementedError("weighted_loss: only scalar `weighted` is supported")

    kind = _device_kind()
    is_v7 = _looks_like_v7(kind)
    if num_parallel is None:
        num_parallel = 2 if is_v7 else 1            # v5e/v6e: single TensorCore
    if target_tile_bytes is None:
        if is_v7:
            target_tile_bytes = 8 << 20             # fast HBM -> amortize per-step overhead
        elif "v5" in kind:
            target_tile_bytes = 2 << 20             # slow HBM -> already amortized
        else:
            target_tile_bytes = 4 << 20             # v6e / unknown
    if use_core_parallel is None:
        use_core_parallel = is_v7

    n_elems = int(B) * int(D)
    itemsize = jnp.dtype(pred.dtype).itemsize

    # ---- lane-dense flattening for small / unaligned feature dims -------------
    pred2d, target2d = pred, target
    Bk, Dk = B, D
    if D % 128 != 0 and n_elems % 128 == 0:
        W = None
        for cand in (1024, 512, 256, 128):          # prefer >= 8 rows for clean tiles
            if n_elems % cand == 0 and n_elems // cand >= 8:
                W = cand
                break
        if W is None:
            for cand in (128, 256, 512, 1024):
                if n_elems % cand == 0:
                    W = cand
                    break
        if W is not None:
            pred2d = pred.reshape(-1, W)             # free bitcast for contiguous arrays
            target2d = target.reshape(-1, W)
            Bk, Dk = pred2d.shape

    # ---- tiling: big lane-dense row tiles, no overhang blocks ------------------
    if tm is None:
        tm0 = max(8, target_tile_bytes // max(1, Dk * itemsize))
    else:
        tm0 = max(8, int(tm))
    cap = max(8, (Bk // 8) * 8)                      # keep block height <= array height
    tm0 = _round_up(min(tm0, cap), 8)

    n_par = max(1, min(int(num_parallel), _cdiv(Bk, tm0)))    # "parallel" axis
    rows_per_par = _cdiv(Bk, n_par)
    n_inner = max(1, _cdiv(rows_per_par, tm0))                # reduction axis
    tm_rows = _round_up(_cdiv(rows_per_par, n_inner), 8)      # rows per grid step

    n_blocks = _cdiv(Bk, tm_rows)                    # real row blocks covering Bk
    total_blocks = n_par * n_inner
    last_blk = n_blocks - 1
    has_tail = (Bk % tm_rows) != 0                   # last real block is partial
    has_overhang = total_blocks > n_blocks           # grid steps past the data (rare)
    tail_rows = Bk - last_blk * tm_rows              # valid rows in the tail block
    lane_partials = (Dk % 128 == 0)

    def kernel(p_ref, t_ref, o_ref, acc_ref):
        p_idx = pl.program_id(0)
        i_idx = pl.program_id(1)
        blk = p_idx * n_inner + i_idx

        @pl.when(i_idx == 0)
        def _():
            acc_ref[...] = jnp.zeros_like(acc_ref)

        def accumulate(valid_rows=None):
            diff = p_ref[...].astype(jnp.float32) - t_ref[...].astype(jnp.float32)
            if loss_type == "l2":
                loss = diff * diff                   # WeightedL2._loss
            else:
                loss = jnp.abs(diff)                 # WeightedL1._loss
            if valid_rows is not None:               # tail block only: (tm,1) vs scalar
                rows = jax.lax.broadcasted_iota(jnp.int32, (tm_rows, 1), 0)
                loss = jnp.where(rows < valid_rows, loss, 0.0)
            # Sublane-group reduce (tm, D) -> (8, D): pure vreg adds, no x-lane work,
            # and no full-tile scratch reload/writeback per step.
            acc_ref[...] += loss.reshape(tm_rows // 8, 8, Dk).sum(axis=0)

        if not has_tail and not has_overhang:
            accumulate()                             # steady state: no masking at all
        elif has_tail:
            if last_blk > 0:
                @pl.when(blk < last_blk)
                def _():
                    accumulate()

            @pl.when(blk == last_blk)
            def _():
                accumulate(valid_rows=tail_rows)
        else:                                        # overhang only: skip fully-OOB steps
            @pl.when(blk <= last_blk)
            def _():
                accumulate()

        @pl.when(i_idx == n_inner - 1)
        def _():
            if lane_partials:
                # One lane-group fold per parallel block; stays elementwise on vregs.
                parts = acc_ref[...].reshape(8, Dk // 128, 128).sum(axis=1)
                o_ref[...] = parts.reshape(1, 8, 128)
            else:
                o_ref[...] = jnp.broadcast_to(jnp.sum(acc_ref[...]), (1, 8, 128))

    def in_map(p, i):
        blk = p * n_inner + i
        if has_overhang:
            blk = jnp.minimum(blk, last_blk)         # keep DMAs in bounds; step is skipped
        return (blk, 0)

    tile_bytes = tm_rows * Dk * itemsize
    acc_bytes = 8 * Dk * 4
    vmem_limit = int(min(48 << 20,
                         max(16 << 20, 2 * 2 * tile_bytes + acc_bytes + (4 << 20))))

    def run(sem0, sem1):
        return pl.pallas_call(
            kernel,
            out_shape=jax.ShapeDtypeStruct((n_par, 8, 128), jnp.float32),
            grid_spec=pltpu.PrefetchScalarGridSpec(
                num_scalar_prefetch=0,
                grid=(n_par, n_inner),
                in_specs=[
                    pl.BlockSpec((tm_rows, Dk), in_map),   # pred tile (native dtype)
                    pl.BlockSpec((tm_rows, Dk), in_map),   # target tile
                ],
                out_specs=pl.BlockSpec((1, 8, 128), lambda p, i: (p, 0, 0)),
                scratch_shapes=[pltpu.VMEM((8, Dk), jnp.float32)],
            ),
            compiler_params=pltpu.CompilerParams(
                dimension_semantics=(sem0, sem1),
                vmem_limit_bytes=vmem_limit,
            ),
        )(pred2d, target2d)

    core_par = getattr(pltpu, "CORE_PARALLEL", None)
    arbitrary = getattr(pltpu, "ARBITRARY", "arbitrary")
    if n_par > 1 and use_core_parallel and core_par is not None:
        # v7x: make sure the leading grid axis really shards across both TensorCores.
        try:
            partials = jax.block_until_ready(run(core_par, arbitrary))
        except Exception:
            partials = run("parallel", "arbitrary")
    else:
        partials = run("parallel", "arbitrary")

    if lane_partials:
        total = jnp.sum(partials)                    # every element is a distinct partial
    else:
        total = jnp.sum(partials[:, 0, 0])           # each block is broadcast-filled
    # (loss * weighted).mean() == sum(loss) * weighted / (B * D) for scalar weighted.
    return total * (w_arr / jnp.float32(n_elems))


if __name__ == "__main__":
    key = jax.random.PRNGKey(0)
    k1, k2, k3, k4, k5, k6 = jax.random.split(key, 6)

    # 1) Small shape consistent with the module: pred/target are [batch_size, dim].
    B, D = 16, 128
    pred = jax.random.normal(k1, (B, D), dtype=jnp.float32)
    target = jax.random.normal(k2, (B, D), dtype=jnp.float32)
    out = jax.block_until_ready(weighted_loss(pred, target, 0.5, loss_type="l2"))
    ref = jnp.mean((pred - target) ** 2 * 0.5)
    assert jnp.allclose(out, ref, rtol=1e-5, atol=1e-5), (out, ref)

    # 2) Non-divisible batch + bf16 streaming + 2-way parallel split + L1 path.
    B2, D2 = 300, 128
    pred2 = jax.random.normal(k3, (B2, D2), dtype=jnp.bfloat16)
    target2 = jax.random.normal(k4, (B2, D2), dtype=jnp.bfloat16)
    out2 = jax.block_until_ready(
        weighted_loss(pred2, target2, 0.25, tm=64, num_parallel=2, loss_type="l1"))
    ref2 = jnp.mean(
        jnp.abs(pred2.astype(jnp.float32) - target2.astype(jnp.float32)) * 0.25)
    assert jnp.allclose(out2, ref2, rtol=1e-3, atol=1e-3), (out2, ref2)

    # 3) Unaligned feature dim (D % 128 != 0) -> lane-dense flatten path.
    B3, D3 = 64, 48
    pred3 = jax.random.normal(k5, (B3, D3), dtype=jnp.float32)
    target3 = jax.random.normal(k6, (B3, D3), dtype=jnp.float32)
    out3 = jax.block_until_ready(weighted_loss(pred3, target3, 2.0, loss_type="l2"))
    ref3 = jnp.mean((pred3 - target3) ** 2 * 2.0)
    assert jnp.allclose(out3, ref3, rtol=1e-5, atol=1e-5), (out3, ref3)

    print("KERNEL_OK")
</pallas_src>

<mosaic_0001>
module attributes {stable_mosaic.version = 11 : i64} {
  func.func @kernel(%arg0: i32, %arg1: i32, %arg2: memref<16x128xf32, #tpu.memory_space<vmem>>, %arg3: memref<16x128xf32, #tpu.memory_space<vmem>>, %arg4: memref<1x8x128xf32, #tpu.memory_space<vmem>>, %arg5: memref<8x128xf32, #tpu.memory_space<vmem>>) attributes {dimension_semantics = [#tpu.dimension_semantics<parallel>, #tpu.dimension_semantics<arbitrary>], iteration_bounds = array<i64: 1, 1>, scalar_prefetch = 0 : i64, scratch_operands = 1 : i64, tpu.core_type = #tpu.core_type<tc>, window_params = [{transform_indices = @transform_0, window_bounds = array<i64: 16, 128>}, {transform_indices = @transform_1, window_bounds = array<i64: 16, 128>}, {transform_indices = @transform_2, window_bounds = array<i64: 1, 8, 128>}]} {
    %c0_i32 = arith.constant 0 : i32
    %0 = arith.cmpi eq, %arg1, %c0_i32 : i32
    %1 = arith.extui %0 : i1 to i32
    %c0_i32_0 = arith.constant 0 : i32
    %2 = arith.cmpi ne, %1, %c0_i32_0 : i32
    scf.if %2 {
      %cst_10 = arith.constant 0.000000e+00 : f32
      %15 = vector.broadcast %cst_10 : f32 to vector<8x128xf32>
      %c0_11 = arith.constant 0 : index
      %c0_12 = arith.constant 0 : index
      %16 = vector.load %arg5[%c0_11, %c0_12] : memref<8x128xf32, #tpu.memory_space<vmem>>, vector<8x128xf32>
      tpu.vector_store %arg5[%c0_11, %c0_12], %15 {strides = array<i32>} : memref<8x128xf32, #tpu.memory_space<vmem>>, vector<8x128xf32>,
    } else {
    }
    %c0 = arith.constant 0 : index
    %c0_1 = arith.constant 0 : index
    %3 = vector.load %arg2[%c0, %c0_1] : memref<16x128xf32, #tpu.memory_space<vmem>>, vector<16x128xf32>
    %c0_2 = arith.constant 0 : index
    %c0_3 = arith.constant 0 : index
    %4 = vector.load %arg3[%c0_2, %c0_3] : memref<16x128xf32, #tpu.memory_space<vmem>>, vector<16x128xf32>
    %5 = arith.subf %3, %4 : vector<16x128xf32>
    %6 = arith.mulf %5, %5 : vector<16x128xf32>
    %c0_4 = arith.constant 0 : index
    %c0_5 = arith.constant 0 : index
    %7 = vector.load %arg5[%c0_4, %c0_5] : memref<8x128xf32, #tpu.memory_space<vmem>>, vector<8x128xf32>
    %8 = vector.shape_cast %6 : vector<16x128xf32> to vector<2x8x128xf32>
    %cst = arith.constant dense<0.000000e+00> : vector<8x128xf32>
    %9 = vector.multi_reduction <add>, %8, %cst [0] : vector<2x8x128xf32> to vector<8x128xf32>
    %10 = arith.addf %7, %9 : vector<8x128xf32>
    %c0_6 = arith.constant 0 : index
    %c0_7 = arith.constant 0 : index
    %11 = vector.load %arg5[%c0_6, %c0_7] : memref<8x128xf32, #tpu.memory_space<vmem>>, vector<8x128xf32>
    tpu.vector_store %arg5[%c0_6, %c0_7], %10 {strides = array<i32>} : memref<8x128xf32, #tpu.memory_space<vmem>>, vector<8x128xf32>,
    %c0_i32_8 = arith.constant 0 : i32
    %12 = arith.cmpi eq, %arg1, %c0_i32_8 : i32
    %13 = arith.extui %12 : i1 to i32
    %c0_i32_9 = arith.constant 0 : i32
    %14 = arith.cmpi ne, %13, %c0_i32_9 : i32
    scf.if %14 {
      %c0_10 = arith.constant 0 : index
      %c0_11 = arith.constant 0 : index
      %15 = vector.load %arg5[%c0_10, %c0_11] : memref<8x128xf32, #tpu.memory_space<vmem>>, vector<8x128xf32>
      %16 = vector.shape_cast %15 : vector<8x128xf32> to vector<8x1x128xf32>
      %cst_12 = arith.constant dense<0.000000e+00> : vector<8x128xf32>
      %17 = vector.multi_reduction <add>, %16, %cst_12 [1] : vector<8x1x128xf32> to vector<8x128xf32>
      %18 = vector.shape_cast %17 : vector<8x128xf32> to vector<1x8x128xf32>
      %c0_13 = arith.constant 0 : index
      %c0_14 = arith.constant 0 : index
      %c0_15 = arith.constant 0 : index
      %19 = vector.load %arg4[%c0_13, %c0_14, %c0_15] : memref<1x8x128xf32, #tpu.memory_space<vmem>>, vector<1x8x128xf32>
      tpu.vector_store %arg4[%c0_13, %c0_14, %c0_15], %18 {strides = array<i32>} : memref<1x8x128xf32, #tpu.memory_space<vmem>>, vector<1x8x128xf32>,
    } else {
    }
    return
  }
  func.func @transform_0(%arg0: i32, %arg1: i32) -> (i32, i32) {
    %c1_i32 = arith.constant 1 : i32
    %0 = arith.muli %arg0, %c1_i32 : i32
    %1 = arith.addi %0, %arg1 : i32
    %c0_i32 = arith.constant 0 : i32
    %c0_i32_0 = arith.constant 0 : i32
    return %1, %c0_i32 : i32, i32
  }
  func.func @transform_1(%arg0: i32, %arg1: i32) -> (i32, i32) {
    %c1_i32 = arith.constant 1 : i32
    %0 = arith.muli %arg0, %c1_i32 : i32
    %1 = arith.addi %0, %arg1 : i32
    %c0_i32 = arith.constant 0 : i32
    %c0_i32_0 = arith.constant 0 : i32
    return %1, %c0_i32 : i32, i32
  }
  func.func @transform_2(%arg0: i32, %arg1: i32) -> (i32, i32, i32) {
    %c0_i32 = arith.constant 0 : i32
    %c0_i32_0 = arith.constant 0 : i32
    %c0_i32_1 = arith.constant 0 : i32
    return %arg0, %c0_i32, %c0_i32_0 : i32, i32, i32
  }
}

</mosaic_0001>

<bundles_post_ra>
// kernel: tpu_custom_call.1
= control target key start
LH: loop header
LB: loop body
LE: loop exit
PB: predicated region body
PF: predicated region fallthrough
CT: control target
= control target key end

     0   :  { %7 = vsyncpa [#allocation4], 0  ;;  %s209_s0 = inlined_call_operand.hbm [shape: f32[16,128], index: 0, kind: input, shape index: {}]   ;;  %s210_s1 = inlined_call_operand.hbm [shape: f32[16,128], index: 1, kind: input, shape index: {}]   ;;  %s211_s2 = inlined_call_operand.hbm [shape: f32[1,8,128], index: 2, kind: output, shape index: {}]  }
   0x1   :  { %8 = vsyncpa [#allocation7], 0 }
   0x2   :  { %9 = vsyncpa [#allocation5], 0  ;;  %s18_s11 = sshll.u32 %s209_s0, 4  ;;  %s180_s12 = smov [#allocation3]   ;;  %s19_s11 = int_to_ptr.hbm [resolvable:$true] %s18_s11 }
   0x3   :  { %s20_s13 = sshll.u32 %s180_s12, 4  ;;  %s35_s16 = sshll.u32 %s210_s1, 4  ;;  %s21_s13 = int_to_ptr.vmem [resolvable:$true] %s20_s13  ;;  %s36_s16 = int_to_ptr.hbm [resolvable:$true] %s35_s16 }
   0x4   :  { %s181_s17 = smov 128   ;;  %s182_s18 = smov 8  }
   0x5   :  { %26 = dma.hbm_to_vmem [thread:$0]  %s19_s11, 256, %s21_s13, [#allocation4], %s181_s17, %s181_s17, %s182_s18  }
   0x6   :  { %s183_s19 = smov [#allocation6]  }
   0x7   :  { %s37_s20 = sshll.u32 %s183_s19, 4  ;;  %s38_s20 = int_to_ptr.vmem [resolvable:$true] %s37_s20 }
   0x8   :  { %43 = dma.hbm_to_vmem [thread:$0]  %s36_s16, 256, %s38_s20, [#allocation7], %s181_s17, %s181_s17, %s182_s18  }
   0x9   :  { %174 = dma.done.wait [#allocation4], 256  }
   0xa   :  { %175 = vsyncadd [#allocation4], 4294967040 }
   0xb   :  { %176 = dma.done.wait [#allocation7], 256  }
   0xc   :  { %177 = vsyncadd [#allocation7], 4294967040  ;;  %v61_v0 = vld [vmem:[#allocation3] sm:$0xff]  ;;  %v62_v1 = vld [vmem:[#allocation3 + $0x8] sm:$0xff]  ;;  %s184_s0 = smov [#allocation8]   ;;  %s86_s23 = sshll.u32 %s211_s2, 4  ;;  %s87_s23 = int_to_ptr.hbm [resolvable:$true] %s86_s23 }
   0xd   :  { %v63_v2 = vld [vmem:[#allocation6] sm:$0xff]  ;;  %v64_v3 = vld [vmem:[#allocation6 + $0x8] sm:$0xff]  ;;  %s84_s1 = sshll.u32 %s184_s0, 4  ;;  %s85_s1 = int_to_ptr.vmem [resolvable:$true] %s84_s1 }
   0xe   :  { %v65_v4 = vsub.f32 %v61_v0, %v63_v2  ;;  %v66_v5 = vsub.f32 %v62_v1, %v64_v3 }
  0x10   :  { %v67_v6 = vmul.f32 %v65_v4, %v65_v4  ;;  %v68_v7 = vmul.f32 %v66_v5, %v66_v5 }
  0x12   :  { %v70_v8 = vadd.f32 %v68_v7, %v67_v6 }
  0x14   :  { %78 = vst [vmem:[#allocation8] sm:$0xff] %v70_v8 }
  0x15   :  { %89 = dma.vmem_to_hbm [thread:$0]  %s85_s1, 128, %s87_s23, [#allocation5]  }
  0x16   :  { %178 = dma.done.wait [#allocation5], 128  }
  0x17   :  { %179 = vsyncadd [#allocation5], 4294967168 }
  0x18   :  { %94 = vsyncpa [#allocation4], 1 }
  0x19   :  { %95 = vsyncpa [#allocation7], 1 }
  0x1a   :  { %96 = vsyncpa [#allocation5], 1 }

</bundles_post_ra>
